<compile_context>
chip_gen: v7x
topology: tpu7x:2x2x1
jax: 0.10.0
libtpu: 0.0.40
codegen_flags: <defaults>
</compile_context>

<pallas_src>
import jax
import jax.numpy as jnp
from jax.experimental import pallas as pl
from jax.experimental.pallas import tpu as pltpu

# ---- synthetic "env_params" / "args" (deterministic, in-script) -------------
OBS_DIM = 10
GOAL_DIM = 6
INPUT_DIM = OBS_DIM + GOAL_DIM      # 16
HID_SIZE = 32                       # args.hid_size
N_HIDS = 2                          # args.n_hids  (two hidden Linear layers)
ACTION_DIM = 4                      # env_params['action']
ACT_LIMIT = 2.0                     # env_params['action_max']
BATCH = 2
# args.activ == ReLU (hidden AND output activation of the mlp trunk)

HID_PAD = 128                       # hidden feature dims padded to one lane-width


def _round_up(n, m):
    return ((n + m - 1) // m) * m


def actor_kernel(x_ref, w1_ref, b1_ref, w2_ref, b2_ref, wm_ref, bm_ref, out_ref):
    """Fused forward pass on one (TB, INPUT_DIM) batch tile:
         h1   = relu(x @ W1 + b1)          # (TB, 128)
         h2   = relu(h1 @ W2 + b2)         # (TB, 128)  (trunk output activation)
         mean = h2 @ Wm + bm               # (TB, ACTION_DIM)
         pi   = tanh(mean) * act_limit
       x / W are bf16, accumulation + elementwise math in f32.
    """
    x = x_ref[...]                                                     # (TB, 16) bf16

    h1 = jnp.dot(x, w1_ref[...], preferred_element_type=jnp.float32) + b1_ref[...]
    h1 = jnp.maximum(h1, 0.0).astype(jnp.bfloat16)

    h2 = jnp.dot(h1, w2_ref[...], preferred_element_type=jnp.float32) + b2_ref[...]
    h2 = jnp.maximum(h2, 0.0).astype(jnp.bfloat16)

    mean = jnp.dot(h2, wm_ref[...], preferred_element_type=jnp.float32) + bm_ref[...]
    out_ref[...] = (jnp.tanh(mean) * ACT_LIMIT).astype(out_ref.dtype)


def _pad_params(params):
    """Pad hidden dims to 128 lanes; weights -> bf16, biases -> f32. Input/action dims stay compact."""
    w1, b1, w2, b2, wm, bm = params

    w1p = jnp.zeros((INPUT_DIM, HID_PAD), jnp.bfloat16).at[:, :HID_SIZE].set(w1.astype(jnp.bfloat16))
    b1p = jnp.zeros((1, HID_PAD), jnp.float32).at[:, :HID_SIZE].set(b1.astype(jnp.float32))
    w2p = jnp.zeros((HID_PAD, HID_PAD), jnp.bfloat16).at[:HID_SIZE, :HID_SIZE].set(w2.astype(jnp.bfloat16))
    b2p = jnp.zeros((1, HID_PAD), jnp.float32).at[:, :HID_SIZE].set(b2.astype(jnp.float32))
    wmp = jnp.zeros((HID_PAD, ACTION_DIM), jnp.bfloat16).at[:HID_SIZE, :].set(wm.astype(jnp.bfloat16))
    bmp = bm.astype(jnp.float32).reshape(1, ACTION_DIM)
    return w1p, b1p, w2p, b2p, wmp, bmp


def actor_forward(x, params, *, tb=2048):
    """x: (B, INPUT_DIM) f32, params: raw (unpadded) f32 weights. Returns (B, ACTION_DIM) f32."""
    w1p, b1p, w2p, b2p, wmp, bmp = _pad_params(params)

    B = x.shape[0]
    # bf16 packs 16 rows per sublane tile -> minimum batch tile of 16.
    tb = max(16, min(tb, _round_up(B, 16)))
    pB = _round_up(B, tb)

    # Only pad the batch dim (feature dim stays compact at INPUT_DIM); no pad pass
    # at all when B is already a multiple of the tile.
    xb = x.astype(jnp.bfloat16)
    if pB != B:
        xb = jnp.pad(xb, ((0, pB - B), (0, 0)))

    grid = (pB // tb,)

    def const_map(i):                                # weights stay resident across grid steps
        return (0, 0)

    out = pl.pallas_call(
        actor_kernel,
        out_shape=jax.ShapeDtypeStruct((pB, ACTION_DIM), jnp.float32),
        grid=grid,
        in_specs=[
            pl.BlockSpec((tb, INPUT_DIM), lambda i: (i, 0)),     # x tile (streamed, compact)
            pl.BlockSpec((INPUT_DIM, HID_PAD), const_map),       # W1
            pl.BlockSpec((1, HID_PAD), const_map),               # b1
            pl.BlockSpec((HID_PAD, HID_PAD), const_map),         # W2
            pl.BlockSpec((1, HID_PAD), const_map),               # b2
            pl.BlockSpec((HID_PAD, ACTION_DIM), const_map),      # Wm
            pl.BlockSpec((1, ACTION_DIM), const_map),            # bm
        ],
        out_specs=pl.BlockSpec((tb, ACTION_DIM), lambda i: (i, 0)),
        compiler_params=pltpu.CompilerParams(
            dimension_semantics=("parallel",),       # v7x: shard batch tiles across 2 TCs
        ),
    )(xb, w1p, b1p, w2p, b2p, wmp, bmp)

    return out[:B, :]


def init_params(key):
    ks = jax.random.split(key, 6)
    scale = 0.1
    w1 = scale * jax.random.normal(ks[0], (INPUT_DIM, HID_SIZE), jnp.float32)
    b1 = scale * jax.random.normal(ks[1], (1, HID_SIZE), jnp.float32)
    w2 = scale * jax.random.normal(ks[2], (HID_SIZE, HID_SIZE), jnp.float32)
    b2 = scale * jax.random.normal(ks[3], (1, HID_SIZE), jnp.float32)
    wm = scale * jax.random.normal(ks[4], (HID_SIZE, ACTION_DIM), jnp.float32)
    bm = scale * jax.random.normal(ks[5], (1, ACTION_DIM), jnp.float32)
    return (w1, b1, w2, b2, wm, bm)


def actor_reference(x, params):
    """Pure-JAX reference mirroring the PyTorch forward with the same bf16 quantization."""
    w1, b1, w2, b2, wm, bm = params
    xb = x.astype(jnp.bfloat16)
    w1b = w1.astype(jnp.bfloat16)
    w2b = w2.astype(jnp.bfloat16)
    wmb = wm.astype(jnp.bfloat16)
    h = jnp.maximum(jnp.dot(xb, w1b, preferred_element_type=jnp.float32) + b1, 0.0)
    h = h.astype(jnp.bfloat16)
    h = jnp.maximum(jnp.dot(h, w2b, preferred_element_type=jnp.float32) + b2, 0.0)
    h = h.astype(jnp.bfloat16)
    mean = jnp.dot(h, wmb, preferred_element_type=jnp.float32) + bm
    return jnp.tanh(mean) * ACT_LIMIT


if __name__ == "__main__":
    key = jax.random.PRNGKey(0)
    k_x, k_p = jax.random.split(key)
    x = jax.random.normal(k_x, (BATCH, INPUT_DIM), jnp.float32)
    params = init_params(k_p)

    out = actor_forward(x, params)
    jax.block_until_ready(out)

    ref = actor_reference(x, params)
    assert out.shape == (BATCH, ACTION_DIM)
    assert jnp.allclose(out, ref, atol=1e-4, rtol=1e-4), (out, ref)
    print("KERNEL_OK")
</pallas_src>

<mosaic_0001>
module attributes {stable_mosaic.version = 11 : i64} {
  func.func @actor_kernel(%arg0: i32, %arg1: memref<16x16xbf16, #tpu.memory_space<vmem>>, %arg2: memref<16x128xbf16, #tpu.memory_space<vmem>>, %arg3: memref<1x128xf32, #tpu.memory_space<vmem>>, %arg4: memref<128x128xbf16, #tpu.memory_space<vmem>>, %arg5: memref<1x128xf32, #tpu.memory_space<vmem>>, %arg6: memref<128x4xbf16, #tpu.memory_space<vmem>>, %arg7: memref<1x4xf32, #tpu.memory_space<vmem>>, %arg8: memref<16x4xf32, #tpu.memory_space<vmem>>) attributes {dimension_semantics = [#tpu.dimension_semantics<parallel>], iteration_bounds = array<i64: 1>, scalar_prefetch = 0 : i64, scratch_operands = 0 : i64, tpu.core_type = #tpu.core_type<tc>, window_params = [{transform_indices = @transform_0, window_bounds = array<i64: 16, 16>}, {pipeline_mode = #tpu.pipeline_mode<synchronous>, transform_indices = @transform_1, window_bounds = array<i64: 16, 128>}, {pipeline_mode = #tpu.pipeline_mode<synchronous>, transform_indices = @transform_2, window_bounds = array<i64: 1, 128>}, {pipeline_mode = #tpu.pipeline_mode<synchronous>, transform_indices = @transform_3, window_bounds = array<i64: 128, 128>}, {pipeline_mode = #tpu.pipeline_mode<synchronous>, transform_indices = @transform_4, window_bounds = array<i64: 1, 128>}, {pipeline_mode = #tpu.pipeline_mode<synchronous>, transform_indices = @transform_5, window_bounds = array<i64: 128, 4>}, {pipeline_mode = #tpu.pipeline_mode<synchronous>, transform_indices = @transform_6, window_bounds = array<i64: 1, 4>}, {transform_indices = @transform_7, window_bounds = array<i64: 16, 4>}]} {
    %c0 = arith.constant 0 : index
    %c0_0 = arith.constant 0 : index
    %0 = vector.load %arg1[%c0, %c0_0] : memref<16x16xbf16, #tpu.memory_space<vmem>>, vector<16x16xbf16>
    %c0_1 = arith.constant 0 : index
    %c0_2 = arith.constant 0 : index
    %1 = vector.load %arg2[%c0_1, %c0_2] : memref<16x128xbf16, #tpu.memory_space<vmem>>, vector<16x128xbf16>
    %cst = arith.constant dense<0.000000e+00> : vector<16x128xf32>
    %2 = tpu.matmul %0, %1, %cst {dimension_numbers = #tpu.dot_dimension_numbers<[1], [0], [0], [1], [0, 0, 1, 1], [], []>} : vector<16x16xbf16>, vector<16x128xbf16>, vector<16x128xf32> -> vector<16x128xf32>
    %c0_3 = arith.constant 0 : index
    %c0_4 = arith.constant 0 : index
    %3 = vector.load %arg3[%c0_3, %c0_4] : memref<1x128xf32, #tpu.memory_space<vmem>>, vector<1x128xf32>
    %4 = vector.broadcast %3 : vector<1x128xf32> to vector<16x128xf32>
    %5 = arith.addf %2, %4 : vector<16x128xf32>
    %cst_5 = arith.constant 0.000000e+00 : f32
    %6 = vector.broadcast %cst_5 : f32 to vector<16x128xf32>
    %7 = arith.maximumf %5, %6 : vector<16x128xf32>
    %8 = arith.truncf %7 : vector<16x128xf32> to vector<16x128xbf16>
    %c0_6 = arith.constant 0 : index
    %c0_7 = arith.constant 0 : index
    %9 = vector.load %arg4[%c0_6, %c0_7] : memref<128x128xbf16, #tpu.memory_space<vmem>>, vector<128x128xbf16>
    %cst_8 = arith.constant dense<0.000000e+00> : vector<16x128xf32>
    %10 = tpu.matmul %8, %9, %cst_8 {dimension_numbers = #tpu.dot_dimension_numbers<[1], [0], [0], [1], [0, 0, 1, 1], [], []>} : vector<16x128xbf16>, vector<128x128xbf16>, vector<16x128xf32> -> vector<16x128xf32>
    %c0_9 = arith.constant 0 : index
    %c0_10 = arith.constant 0 : index
    %11 = vector.load %arg5[%c0_9, %c0_10] : memref<1x128xf32, #tpu.memory_space<vmem>>, vector<1x128xf32>
    %12 = vector.broadcast %11 : vector<1x128xf32> to vector<16x128xf32>
    %13 = arith.addf %10, %12 : vector<16x128xf32>
    %cst_11 = arith.constant 0.000000e+00 : f32
    %14 = vector.broadcast %cst_11 : f32 to vector<16x128xf32>
    %15 = arith.maximumf %13, %14 : vector<16x128xf32>
    %16 = arith.truncf %15 : vector<16x128xf32> to vector<16x128xbf16>
    %c0_12 = arith.constant 0 : index
    %c0_13 = arith.constant 0 : index
    %17 = vector.load %arg6[%c0_12, %c0_13] : memref<128x4xbf16, #tpu.memory_space<vmem>>, vector<128x4xbf16>
    %cst_14 = arith.constant dense<0.000000e+00> : vector<16x4xf32>
    %18 = tpu.matmul %16, %17, %cst_14 {dimension_numbers = #tpu.dot_dimension_numbers<[1], [0], [0], [1], [0, 0, 1, 1], [], []>} : vector<16x128xbf16>, vector<128x4xbf16>, vector<16x4xf32> -> vector<16x4xf32>
    %c0_15 = arith.constant 0 : index
    %c0_16 = arith.constant 0 : index
    %19 = vector.load %arg7[%c0_15, %c0_16] : memref<1x4xf32, #tpu.memory_space<vmem>>, vector<1x4xf32>
    %20 = vector.broadcast %19 : vector<1x4xf32> to vector<16x4xf32>
    %21 = arith.addf %18, %20 : vector<16x4xf32>
    %22 = math.tanh %21 : vector<16x4xf32>
    %cst_17 = arith.constant 2.000000e+00 : f32
    %23 = vector.broadcast %cst_17 : f32 to vector<16x4xf32>
    %24 = arith.mulf %22, %23 : vector<16x4xf32>
    %c0_18 = arith.constant 0 : index
    %c0_19 = arith.constant 0 : index
    %25 = vector.load %arg8[%c0_18, %c0_19] : memref<16x4xf32, #tpu.memory_space<vmem>>, vector<16x4xf32>
    tpu.vector_store %arg8[%c0_18, %c0_19], %24 {strides = array<i32>} : memref<16x4xf32, #tpu.memory_space<vmem>>, vector<16x4xf32>,
    return
  }
  func.func @transform_0(%arg0: i32) -> (i32, i32) {
    %c0_i32 = arith.constant 0 : i32
    %c0_i32_0 = arith.constant 0 : i32
    return %arg0, %c0_i32 : i32, i32
  }
  func.func @transform_1(%arg0: i32) -> (i32, i32) {
    %c0_i32 = arith.constant 0 : i32
    %c0_i32_0 = arith.constant 0 : i32
    %c0_i32_1 = arith.constant 0 : i32
    return %c0_i32, %c0_i32_0 : i32, i32
  }
  func.func @transform_2(%arg0: i32) -> (i32, i32) {
    %c0_i32 = arith.constant 0 : i32
    %c0_i32_0 = arith.constant 0 : i32
    %c0_i32_1 = arith.constant 0 : i32
    return %c0_i32, %c0_i32_0 : i32, i32
  }
  func.func @transform_3(%arg0: i32) -> (i32, i32) {
    %c0_i32 = arith.constant 0 : i32
    %c0_i32_0 = arith.constant 0 : i32
    %c0_i32_1 = arith.constant 0 : i32
    return %c0_i32, %c0_i32_0 : i32, i32
  }
  func.func @transform_4(%arg0: i32) -> (i32, i32) {
    %c0_i32 = arith.constant 0 : i32
    %c0_i32_0 = arith.constant 0 : i32
    %c0_i32_1 = arith.constant 0 : i32
    return %c0_i32, %c0_i32_0 : i32, i32
  }
  func.func @transform_5(%arg0: i32) -> (i32, i32) {
    %c0_i32 = arith.constant 0 : i32
    %c0_i32_0 = arith.constant 0 : i32
    %c0_i32_1 = arith.constant 0 : i32
    return %c0_i32, %c0_i32_0 : i32, i32
  }
  func.func @transform_6(%arg0: i32) -> (i32, i32) {
    %c0_i32 = arith.constant 0 : i32
    %c0_i32_0 = arith.constant 0 : i32
    %c0_i32_1 = arith.constant 0 : i32
    return %c0_i32, %c0_i32_0 : i32, i32
  }
  func.func @transform_7(%arg0: i32) -> (i32, i32) {
    %c0_i32 = arith.constant 0 : i32
    %c0_i32_0 = arith.constant 0 : i32
    return %arg0, %c0_i32 : i32, i32
  }
}

</mosaic_0001>

<bundles_post_ra>
// kernel: tpu_custom_call.1
= control target key start
LH: loop header
LB: loop body
LE: loop exit
PB: predicated region body
PF: predicated region fallthrough
CT: control target
= control target key end

     0   :  { %12 = vsyncpa [#allocation3], 0  ;;  %s489_s24 = smov [#allocation2]   ;;  %s632_s0 = inlined_call_operand.vmem [shape: bf16[16,16], index: 0, kind: input, shape index: {}]   ;;  %s633_s1 = inlined_call_operand.hbm [shape: bf16[16,128], index: 1, kind: input, shape index: {}]   ;;  %s634_s2 = inlined_call_operand.vmem [shape: f32[1,128], index: 2, kind: input, shape index: {}]   ;;  %s635_s3 = inlined_call_operand.vmem [shape: bf16[128,128], index: 3, kind: input, shape index: {}]   ;;  %s636_s4 = inlined_call_operand.vmem [shape: f32[1,128], index: 4, kind: input, shape index: {}]   ;;  %s637_s5 = inlined_call_operand.vmem [shape: bf16[128,4], index: 5, kind: input, shape index: {}]   ;;  %s638_s6 = inlined_call_operand.vmem [shape: f32[1,4], index: 6, kind: input, shape index: {}]   ;;  %s639_s7 = inlined_call_operand.vmem [shape: f32[16,4], index: 7, kind: output, shape index: {}]  }
   0x1   :  { %s20_s25 = sshll.u32 %s489_s24, 4  ;;  %s465_s28 = scalar_lea.hbm %s633_s1, 128  ;;  %s21_s25 = int_to_ptr.vmem [resolvable:$true] %s20_s25 }
   0x2   :  { %p466_p0 = scmp.ne.s32.totalorder %s633_s1, %s465_s28  ;;  %p469_p1 = scmp.lt.u32.totalorder %s465_s28, %s633_s1 }
   0x4   :  { %p471_p2 = pnand %p469_p1, %p466_p0 }
   0x6   :  { %474 = shalt.err (!%p471_p2)
}
   0x7   :  { %s475_s10 = scalar_lea.vmem %s21_s25, 128  ;;  %p480_p4 = scmp.lt.s32.totalorder %s21_s25, %s21_s25 }
   0x8   :  { %p476_p3 = scmp.ne.s32.totalorder %s21_s25, %s475_s10  ;;  %p481_p5 = scmp.lt.s32.totalorder %s475_s10, %s475_s10 }
   0xa   :  { %p482_p6 = por %p481_p5, %p480_p4 }
   0xc   :  { %p483_p7 = pnand %p482_p6, %p476_p3 }
   0xe   :  { %486 = shalt.err (!%p483_p7)
}
   0xf   :  { %s490_s11 = smov 64   ;;  %s491_s12 = smov 4  }
  0x10   :  { %26 = dma.hbm_to_vmem [thread:$0]  %s633_s1, 128, %s21_s25, [#allocation3], %s490_s11, %s490_s11, %s491_s12  }
  0x11   :  { %487 = dma.done.wait [#allocation3], 128  }
  0x12   :  { %488 = vsyncadd [#allocation3], 4294967168  ;;  %v492_v0 = vmov 0.0   ;;  %vm493_vm0 = vmmov 0   ;;  %v443_v1 = vld [vmem:[#allocation2] sm:$0xff]   ;;  %vm63_vm1 = vcmask 130048  }
  0x13   :  { %392 = vmatprep.subr.bf16.mxu0 %v492_v0  ;;  %394 = vmatprep.mubr.msk.bf16.mxu0 %vm493_vm0, %v492_v0  ;;  %v444_v2 = vld [vmem:[%s632_s0] sm:$0xff]   ;;  %v446_v4 = vld [vmem:[%s635_s3 + $0x8] sm:$0xff]   ;;  %v447_v5 = vld [vmem:[%s635_s3 + $0x10] sm:$0xff]   ;;  %vm342_vm2 = vcmask 31744  }
  0x14   :  { %398 = vmatprep.subr.bf16.mxu1 %v492_v0  ;;  %414 = vmatprep.mubr.msk.bf16.mxu1 %vm493_vm0, %v492_v0  ;;  %v445_v3 = vld [vmem:[%s635_s3] sm:$0xff]   ;;  %v448_v6 = vld [vmem:[%s635_s3 + $0x18] sm:$0xff]   ;;  %v450_v8 = vld [vmem:[%s635_s3 + $0x28] sm:$0xff]  }
  0x15   :  { %393 = vmatpush3.bf16.msra.mxu0 %v443_v1  ;;  %399 = vmatpush3.bf16.msra.mxu1 %v445_v3  ;;  %v449_v7 = vld [vmem:[%s635_s3 + $0x20] sm:$0xff]   ;;  %v451_v9 = vld [vmem:[%s635_s3 + $0x30] sm:$0xff]   ;;  %v452_v10 = vld [vmem:[%s635_s3 + $0x38] sm:$0xff]  }
  0x16   :  { %418 = vmatprep.subr.bf16.mxu0 %v492_v0  ;;  %400 = vmatprep.subr.bf16.mxu1 %v492_v0  ;;  %v453_v11 = vld [vmem:[%s637_s5] sm:$0xff]   ;;  %v454_v12 = vld [vmem:[%s637_s5 + $0x8] sm:$0xff]   ;;  %v455_v13 = vld [vmem:[%s637_s5 + $0x10] sm:$0xff]  }
  0x17   :  { %v456_v14 = vld [vmem:[%s637_s5 + $0x18] sm:$0xff]   ;;  %v457_v15 = vld [vmem:[%s637_s5 + $0x20] sm:$0xff]   ;;  %v458_v16 = vld [vmem:[%s637_s5 + $0x28] sm:$0xff]  }
  0x18   :  { %395 = vmatmul.mubr.msk.bf16.vlgmr.msra.gmra.mrb[0].mxu0 %vm63_vm1, %v444_v2  ;;  %v350_v17 = vld [vmem:[%s634_s2] ss:$0 sm:$0xff]  ;;  %v459_v27 = vld [vmem:[%s637_s5 + $0x30] sm:$0xff]   ;;  %v460_v28 = vld [vmem:[%s637_s5 + $0x38] sm:$0xff]  }
  0x19   :  { %434 = vmatprep.mubr.msk.bf16.mxu0 %vm493_vm0, %v492_v0  ;;  %401 = vmatpush3.bf16.msra.mxu1 %v446_v4  ;;  %v354_v29 = vld [vmem:[%s636_s4] ss:$0 sm:$0xff] }
  0x1a   :  { %402 = vmatprep.subr.bf16.mxu1 %v492_v0  ;;  %419 = vmatpush3.bf16.msra.mxu0 %v453_v11  ;;  %v363_v39 = vld [vmem:[%s638_s6] ss:$0 sm:$0xff] }
  0x1b   :  { %420 = vmatprep.subr.bf16.mxu0 %v492_v0 }
  0x1d   :  { %403 = vmatpush3.bf16.msra.mxu1 %v447_v5 }
  0x1e   :  { %404 = vmatprep.subr.bf16.mxu1 %v492_v0  ;;  %421 = vmatpush3.bf16.msra.mxu0 %v454_v12 }
  0x1f   :  { %422 = vmatprep.subr.bf16.mxu0 %v492_v0 }
  0x21   :  { %405 = vmatpush3.bf16.msra.mxu1 %v448_v6 }
  0x22   :  { %406 = vmatprep.subr.bf16.mxu1 %v492_v0  ;;  %423 = vmatpush3.bf16.msra.mxu0 %v455_v13 }
  0x23   :  { %424 = vmatprep.subr.bf16.mxu0 %v492_v0 }
  0x25   :  { %407 = vmatpush3.bf16.msra.mxu1 %v449_v7 }
  0x26   :  { %408 = vmatprep.subr.bf16.mxu1 %v492_v0  ;;  %425 = vmatpush3.bf16.msra.mxu0 %v456_v14 }
  0x27   :  { %426 = vmatprep.subr.bf16.mxu0 %v492_v0 }
  0x29   :  { %409 = vmatpush3.bf16.msra.mxu1 %v450_v8 }
  0x2a   :  { %410 = vmatprep.subr.bf16.mxu1 %v492_v0  ;;  %427 = vmatpush3.bf16.msra.mxu0 %v457_v15 }
  0x2b   :  { %428 = vmatprep.subr.bf16.mxu0 %v492_v0 }
  0x2d   :  { %411 = vmatpush3.bf16.msra.mxu1 %v451_v9 }
  0x2e   :  { %412 = vmatprep.subr.bf16.mxu1 %v492_v0  ;;  %429 = vmatpush3.bf16.msra.mxu0 %v458_v16 }
  0x2f   :  { %430 = vmatprep.subr.bf16.mxu0 %v492_v0 }
  0x31   :  { %413 = vmatpush3.bf16.msra.mxu1 %v452_v10 }
  0x32   :  { %431 = vmatpush3.bf16.msra.mxu0 %v459_v27 }
  0x33   :  { %432 = vmatprep.subr.bf16.mxu0 %v492_v0 }
  0x36   :  { %433 = vmatpush3.bf16.msra.mxu0 %v460_v28 }
  0xeb   :  { %v101_v18 = vpop.f32.mrb[0].mxu0 }
  0xec   :  { %v102_v19 = vadd.f32 %v350_v17, %v101_v18  ;;  %v396_v20 = vpop.f32.mrb[1].mxu0 }
  0xed   :  { %v104_v21 = vpop.f32.mrb[2].mxu0 }
  0xee   :  { %v105_v22 = vadd.f32 %v350_v17, %v104_v21  ;;  %v397_v23 = vpop.f32.mrb[3].mxu0  ;;  %v108_v24 = vmax.f32 %v102_v19, 0.0 }
  0xf0   :  { %v109_v25 = vmax.f32 %v105_v22, 0.0 }
  0xf2   :  { %v110_v26 = vpack.c.bf16 %v109_v25, %v108_v24 }
  0xf4   :  { %415 = vmatmul.mubr.bf16.vlgmr.msra.gmra.mrb[0].mxu1 %v110_v26 }
 0x1c7   :  { %v216_v30 = vpop.f32.mrb[0].mxu1 }
 0x1c8   :  { %v217_v31 = vadd.f32 %v354_v29, %v216_v30  ;;  %v416_v32 = vpop.f32.mrb[1].mxu1 }
 0x1c9   :  { %v219_v33 = vpop.f32.mrb[2].mxu1 }
 0x1ca   :  { %v220_v34 = vadd.f32 %v354_v29, %v219_v33  ;;  %v417_v35 = vpop.f32.mrb[3].mxu1  ;;  %v223_v36 = vmax.f32 %v217_v31, 0.0 }
 0x1cc   :  { %v224_v37 = vmax.f32 %v220_v34, 0.0 }
 0x1ce   :  { %v225_v38 = vpack.c.bf16 %v224_v37, %v223_v36 }
 0x1d0   :  { %435 = vmatmul.mubr.bf16.vlgmr.msra.gmra.mrb[4].mxu0 %v225_v38 }
 0x2a3   :  { %v331_v40 = vpop.f32.mrb[4].mxu0 }
 0x2a4   :  { %v332_v41 = vadd.f32 %v363_v39, %v331_v40  ;;  %v436_v42 = vpop.f32.mrb[5].mxu0 }
 0x2a5   :  { %v334_v43 = vpop.f32.mrb[6].mxu0 }
 0x2a6   :  { %461 = vtanh.f32 %v332_v41  ;;  %v335_v44 = vadd.f32 %v363_v39, %v334_v43  ;;  %v437_v45 = vpop.f32.mrb[7].mxu0 }
 0x2a8   :  { %463 = vtanh.f32 %v335_v44 }
 0x2b0   :  { %v462_v46 = vpop.eup %461 }
 0x2b1   :  { %v340_v47 = vmul.f32 2.0, %v462_v46 }
 0x2b2   :  { %v464_v48 = vpop.eup %463 }
 0x2b3   :  { %343 = vst.msk [vmem:[%s639_s7] sm:$0xff] %vm342_vm2, %v340_v47  ;;  %v341_v49 = vmul.f32 2.0, %v464_v48 }
 0x2b5   :  { %344 = vst.msk [vmem:[%s639_s7 + $0x8] sm:$0xff] %vm342_vm2, %v341_v49 }
 0x2b6   :  { %349 = vsyncpa [#allocation3], 1 }

</bundles_post_ra>
